<compile_context>
chip_gen: v5e
topology: v5e:2x2
jax: 0.10.0
libtpu: 0.0.40
codegen_flags: <defaults>
</compile_context>

<pallas_src>
import functools

import jax
import jax.numpy as jnp
from jax.experimental import pallas as pl
from jax.experimental.pallas import tpu as pltpu

INPUT_SIZE = 70
HIDDEN_SIZE = 128
OUTPUT_SIZE = 5
W2_PAD = 128           # fc2 weights lane-padded to 128 columns for the MXU
DEFAULT_TILE_B = 4096  # large batch tile to amortize per-grid-step overhead


def _round_up(x, m):
    return ((x + m - 1) // m) * m


def mlp_kernel(x_ref, w1_ref, b1_ref, w2_ref, b2_ref, o_ref):
    # Cast the streamed f32 x block to bf16 in-kernel (cheap VPU convert,
    # hidden under DMA slack) instead of a separate wrapper-side XLA pass.
    x_bf = x_ref[...].astype(jnp.bfloat16)
    # fc1 on the MXU: bf16 operands, f32 accumulation.
    h = jnp.dot(x_bf, w1_ref[...],
                preferred_element_type=jnp.float32)          # (tile_b, 128) f32
    # Bias + ReLU on the VPU in f32.
    h = jnp.maximum(h + b1_ref[...], 0.0)
    # fc2 on the MXU (w2 lane-padded to 128 columns), f32 accumulation.
    out = jnp.dot(h.astype(jnp.bfloat16), w2_ref[...],
                  preferred_element_type=jnp.float32)        # (tile_b, 128) f32
    # Store only the 5 real output columns: 20 B/row instead of 512 B/row.
    o_ref[...] = (out[:, :OUTPUT_SIZE] + b2_ref[...]).astype(o_ref.dtype)


@functools.partial(jax.jit, static_argnames=("tile_b",))
def simple_nn_forward(x, w1, b1, w2, b2, *, tile_b=DEFAULT_TILE_B):
    """x: (B, INPUT_SIZE) f32; w1: (INPUT_SIZE, HIDDEN); w2: (HIDDEN, OUTPUT).

    Weights are stored pre-transposed to (in, out), so the kernel computes
    x @ W + b == PyTorch's x @ W.T + b.  Returns (B, OUTPUT_SIZE) f32.
    """
    B = x.shape[0]

    # Tile sizing: keep the first block fully in-bounds; only the tail block
    # may be partial (masked by Pallas).  16-aligned for bf16 row packing.
    tile_b = min(tile_b, B)
    if tile_b >= 16:
        tile_b = (tile_b // 16) * 16
    grid = (pl.cdiv(B, tile_b),)

    # Tiny weights/biases: cast once in the wrapper, stay resident in VMEM
    # (constant index_map -> DMA'd once, no per-step refetch).
    w1_bf = w1.astype(jnp.bfloat16)
    w2_bf = jnp.pad(w2, ((0, 0), (0, W2_PAD - OUTPUT_SIZE))).astype(jnp.bfloat16)
    b1_2d = b1.reshape(1, HIDDEN_SIZE).astype(jnp.float32)
    b2_2d = b2.reshape(1, OUTPUT_SIZE).astype(jnp.float32)

    flops = 2 * B * (INPUT_SIZE * HIDDEN_SIZE + HIDDEN_SIZE * W2_PAD)
    bytes_accessed = (B * INPUT_SIZE * 4            # x read (f32)
                      + B * OUTPUT_SIZE * 4         # out write (f32, 5 cols)
                      + INPUT_SIZE * HIDDEN_SIZE * 2
                      + HIDDEN_SIZE * 4
                      + HIDDEN_SIZE * W2_PAD * 2
                      + OUTPUT_SIZE * 4)

    return pl.pallas_call(
        mlp_kernel,
        out_shape=jax.ShapeDtypeStruct((B, OUTPUT_SIZE), jnp.float32),
        grid=grid,
        in_specs=[
            # x: one (tile_b, 70) f32 block per grid step (double-buffered).
            pl.BlockSpec((tile_b, INPUT_SIZE), lambda i: (i, 0)),
            # Weights/biases: constant index_map -> VMEM-resident.
            pl.BlockSpec((INPUT_SIZE, HIDDEN_SIZE), lambda i: (0, 0)),
            pl.BlockSpec((1, HIDDEN_SIZE), lambda i: (0, 0)),
            pl.BlockSpec((HIDDEN_SIZE, W2_PAD), lambda i: (0, 0)),
            pl.BlockSpec((1, OUTPUT_SIZE), lambda i: (0, 0)),
        ],
        out_specs=pl.BlockSpec((tile_b, OUTPUT_SIZE), lambda i: (i, 0)),
        compiler_params=pltpu.CompilerParams(
            # Batch axis is embarrassingly parallel (megacore split on v7x).
            # TODO(synk): if xprof on v7x shows one TC doing all grid steps,
            # switch to pltpu.CORE_PARALLEL to guarantee the 2-TC split.
            dimension_semantics=("parallel",),
            # Headroom for large tiles; well within v5e/v6e 128 MiB and
            # v7x 64 MiB physical VMEM.
            vmem_limit_bytes=48 * 1024 * 1024,
        ),
        cost_estimate=pl.CostEstimate(
            flops=flops, transcendentals=0, bytes_accessed=bytes_accessed),
    )(x.astype(jnp.float32), w1_bf, b1_2d, w2_bf, b2_2d)


def init_params(key):
    # Deterministic init mimicking nn.Linear's U(-1/sqrt(fan_in), 1/sqrt(fan_in)).
    k1, k2, k3, k4 = jax.random.split(key, 4)
    bound1 = 1.0 / jnp.sqrt(INPUT_SIZE)
    bound2 = 1.0 / jnp.sqrt(HIDDEN_SIZE)
    # Stored already transposed to (in, out) for the kernel.
    w1 = jax.random.uniform(k1, (INPUT_SIZE, HIDDEN_SIZE), jnp.float32,
                            -bound1, bound1)
    b1 = jax.random.uniform(k2, (HIDDEN_SIZE,), jnp.float32, -bound1, bound1)
    w2 = jax.random.uniform(k3, (HIDDEN_SIZE, OUTPUT_SIZE), jnp.float32,
                            -bound2, bound2)
    b2 = jax.random.uniform(k4, (OUTPUT_SIZE,), jnp.float32, -bound2, bound2)
    return w1, b1, w2, b2


if __name__ == "__main__":
    key = jax.random.PRNGKey(0)
    kx, kp = jax.random.split(key)

    # Small demo shapes: batch=40 with tile_b=16 exercises a 3-step grid and
    # the ragged-tail (masked edge block) path with no wrapper-side padding.
    batch = 40
    x = jax.random.normal(kx, (batch, INPUT_SIZE), jnp.float32)
    w1, b1, w2, b2 = init_params(kp)

    out = simple_nn_forward(x, w1, b1, w2, b2, tile_b=16)
    out = jax.block_until_ready(out)

    # Pure-JAX f32 reference (loose tolerance: kernel streams bf16 operands
    # with f32 accumulation -- intentional precision trade-off).
    ref = jnp.maximum(x @ w1 + b1, 0.0) @ w2 + b2
    assert out.shape == (batch, OUTPUT_SIZE)
    assert jnp.allclose(out, ref, atol=3e-2, rtol=3e-2), (
        float(jnp.max(jnp.abs(out - ref))))

    print("KERNEL_OK")
</pallas_src>

<mosaic_0001>
module attributes {stable_mosaic.version = 11 : i64} {
  func.func @mlp_kernel(%arg0: i32, %arg1: memref<16x70xf32, #tpu.memory_space<vmem>>, %arg2: memref<70x128xbf16, #tpu.memory_space<vmem>>, %arg3: memref<1x128xf32, #tpu.memory_space<vmem>>, %arg4: memref<128x128xbf16, #tpu.memory_space<vmem>>, %arg5: memref<1x5xf32, #tpu.memory_space<vmem>>, %arg6: memref<16x5xf32, #tpu.memory_space<vmem>>) attributes {dimension_semantics = [#tpu.dimension_semantics<parallel>], iteration_bounds = array<i64: 3>, scalar_prefetch = 0 : i64, scratch_operands = 0 : i64, tpu.core_type = #tpu.core_type<tc>, window_params = [{transform_indices = @transform_0, window_bounds = array<i64: 16, 70>}, {pipeline_mode = #tpu.pipeline_mode<synchronous>, transform_indices = @transform_1, window_bounds = array<i64: 70, 128>}, {pipeline_mode = #tpu.pipeline_mode<synchronous>, transform_indices = @transform_2, window_bounds = array<i64: 1, 128>}, {pipeline_mode = #tpu.pipeline_mode<synchronous>, transform_indices = @transform_3, window_bounds = array<i64: 128, 128>}, {pipeline_mode = #tpu.pipeline_mode<synchronous>, transform_indices = @transform_4, window_bounds = array<i64: 1, 5>}, {transform_indices = @transform_5, window_bounds = array<i64: 16, 5>}]} {
    %c0 = arith.constant 0 : index
    %c0_0 = arith.constant 0 : index
    %0 = vector.load %arg1[%c0, %c0_0] : memref<16x70xf32, #tpu.memory_space<vmem>>, vector<16x70xf32>
    %1 = arith.truncf %0 : vector<16x70xf32> to vector<16x70xbf16>
    %c0_1 = arith.constant 0 : index
    %c0_2 = arith.constant 0 : index
    %2 = vector.load %arg2[%c0_1, %c0_2] : memref<70x128xbf16, #tpu.memory_space<vmem>>, vector<70x128xbf16>
    %cst = arith.constant dense<0.000000e+00> : vector<16x128xf32>
    %3 = tpu.matmul %1, %2, %cst {dimension_numbers = #tpu.dot_dimension_numbers<[1], [0], [0], [1], [0, 0, 1, 1], [], []>} : vector<16x70xbf16>, vector<70x128xbf16>, vector<16x128xf32> -> vector<16x128xf32>
    %c0_3 = arith.constant 0 : index
    %c0_4 = arith.constant 0 : index
    %4 = vector.load %arg3[%c0_3, %c0_4] : memref<1x128xf32, #tpu.memory_space<vmem>>, vector<1x128xf32>
    %5 = vector.broadcast %4 : vector<1x128xf32> to vector<16x128xf32>
    %6 = arith.addf %3, %5 : vector<16x128xf32>
    %cst_5 = arith.constant 0.000000e+00 : f32
    %7 = vector.broadcast %cst_5 : f32 to vector<16x128xf32>
    %8 = arith.maximumf %6, %7 : vector<16x128xf32>
    %9 = arith.truncf %8 : vector<16x128xf32> to vector<16x128xbf16>
    %c0_6 = arith.constant 0 : index
    %c0_7 = arith.constant 0 : index
    %10 = vector.load %arg4[%c0_6, %c0_7] : memref<128x128xbf16, #tpu.memory_space<vmem>>, vector<128x128xbf16>
    %cst_8 = arith.constant dense<0.000000e+00> : vector<16x128xf32>
    %11 = tpu.matmul %9, %10, %cst_8 {dimension_numbers = #tpu.dot_dimension_numbers<[1], [0], [0], [1], [0, 0, 1, 1], [], []>} : vector<16x128xbf16>, vector<128x128xbf16>, vector<16x128xf32> -> vector<16x128xf32>
    %12 = vector.extract_strided_slice %11 {offsets = [0, 0], sizes = [16, 5], strides = [1, 1]} : vector<16x128xf32> to vector<16x5xf32>
    %c0_9 = arith.constant 0 : index
    %c0_10 = arith.constant 0 : index
    %13 = vector.load %arg5[%c0_9, %c0_10] : memref<1x5xf32, #tpu.memory_space<vmem>>, vector<1x5xf32>
    %14 = vector.broadcast %13 : vector<1x5xf32> to vector<16x5xf32>
    %15 = arith.addf %12, %14 : vector<16x5xf32>
    %c0_11 = arith.constant 0 : index
    %c0_12 = arith.constant 0 : index
    %16 = vector.load %arg6[%c0_11, %c0_12] : memref<16x5xf32, #tpu.memory_space<vmem>>, vector<16x5xf32>
    tpu.vector_store %arg6[%c0_11, %c0_12], %15 {strides = array<i32>} : memref<16x5xf32, #tpu.memory_space<vmem>>, vector<16x5xf32>,
    return
  }
  func.func @transform_0(%arg0: i32) -> (i32, i32) {
    %c0_i32 = arith.constant 0 : i32
    %c0_i32_0 = arith.constant 0 : i32
    return %arg0, %c0_i32 : i32, i32
  }
  func.func @transform_1(%arg0: i32) -> (i32, i32) {
    %c0_i32 = arith.constant 0 : i32
    %c0_i32_0 = arith.constant 0 : i32
    %c0_i32_1 = arith.constant 0 : i32
    return %c0_i32, %c0_i32_0 : i32, i32
  }
  func.func @transform_2(%arg0: i32) -> (i32, i32) {
    %c0_i32 = arith.constant 0 : i32
    %c0_i32_0 = arith.constant 0 : i32
    %c0_i32_1 = arith.constant 0 : i32
    return %c0_i32, %c0_i32_0 : i32, i32
  }
  func.func @transform_3(%arg0: i32) -> (i32, i32) {
    %c0_i32 = arith.constant 0 : i32
    %c0_i32_0 = arith.constant 0 : i32
    %c0_i32_1 = arith.constant 0 : i32
    return %c0_i32, %c0_i32_0 : i32, i32
  }
  func.func @transform_4(%arg0: i32) -> (i32, i32) {
    %c0_i32 = arith.constant 0 : i32
    %c0_i32_0 = arith.constant 0 : i32
    %c0_i32_1 = arith.constant 0 : i32
    return %c0_i32, %c0_i32_0 : i32, i32
  }
  func.func @transform_5(%arg0: i32) -> (i32, i32) {
    %c0_i32 = arith.constant 0 : i32
    %c0_i32_0 = arith.constant 0 : i32
    return %arg0, %c0_i32 : i32, i32
  }
}

</mosaic_0001>

<bundles_post_ra>
// kernel: simple_nn_forward.1
= control target key start
LH: loop header
LB: loop body
LE: loop exit
PB: predicated region body
PF: predicated region fallthrough
CT: control target
= control target key end

     0   :  { %s918_s18 = smov 0   ;;  %s920_s19 = smov 0   ;;  %s1046_s0 = inlined_call_operand.vmem [shape: f32[40,70], index: 0, kind: input, shape index: {}]   ;;  %s1047_s1 = inlined_call_operand.vmem [shape: bf16[70,128], index: 1, kind: input, shape index: {}]   ;;  %s1048_s2 = inlined_call_operand.vmem [shape: f32[1,128], index: 2, kind: input, shape index: {}]   ;;  %s1049_s3 = inlined_call_operand.vmem [shape: bf16[128,128], index: 3, kind: input, shape index: {}]   ;;  %s1050_s4 = inlined_call_operand.vmem [shape: f32[1,5], index: 4, kind: input, shape index: {}]   ;;  %s1051_s5 = inlined_call_operand.vmem [shape: f32[40,5], index: 5, kind: output, shape index: {}]  }
   0x1   :  { %s922_s20 = smov 0  }
   0x2 LB: > { %s931_s21 = sadd.s32 4294967295, %s854_s20   ;;  %s933_s22 = sadd.s32 1, %s854_s20   ;;  %s854_s20 = sphi %s922_s20, %s1055_s20   ;;  %s850_s19 = sphi %s920_s19, %s1054_s19   ;;  %s846_s18 = sphi %s918_s18, %s1053_s18  }
   0x3   : > { %s129_s23 = ssub.s32 %s854_s20, %s933_s22  ;;  %s132_s24 = sadd.s32 1, %s850_s19 }
   0x4   : > { %p130_p0 = scmp.eq.s32.totalorder %s129_s23, 0  ;;  %p142_p1 = scmp.ne.s32.totalorder %s850_s19, %s846_s18 }
   0x5   : > { %p143_p2 = scmp.eq.s32.totalorder %s931_s21, 2  ;;  %p625_p3 = scmp.ge.s32.totalorder %s854_s20, 1 }
   0x6   : > { %s941_s25 = scalar_select %p130_p0, %s850_s19, %s132_s24  }
   0x7   : > { %p943_p4 = por %p143_p2, %p142_p1  ;;  %p196_p5 = scmp.lt.s32.totalorder %s854_s20, 4 }
   0x9   : > { %p197_p6 = pnand %p625_p3, %p196_p5 }
   0xa   : > { %s951_s29 = sshll.u32 (!%p197_p6), %s931_s21, 1 }
   0xb   : > { %200 = sbr.rel (%p197_p6) target bundleno = 357 (0x165), region = 40  ;;  %p232_p7 = scmp.lt.s32.totalorder (!%p197_p6), %s951_s29, 4 }
  0x10   : > { %v258_v0 = vld [vmem:[%s1047_s1 + $0x20] sm:$0x7]  ;;  %v706_v2 = vld [vmem:[%s1049_s3 + $0x38] sm:$0xff]  ;;  %vm294_vm0 = vcmask 1042432   ;;  %v705_v4 = vld [vmem:[%s1049_s3 + $0x30] sm:$0xff]  ;;  %s233_s13 = scalar_select %p232_p7, %s951_s29, 4 }
  0x11   : > { %v280_v1 = vunpack.c.l.b16 %v258_v0  ;;  %379 = vmatpush.bf16.msra.mxu1 %v706_v2  ;;  %v698_v6 = vld [vmem:[%s1047_s1 + $0x18] sm:$0xff]  ;;  %v704_v7 = vld [vmem:[%s1049_s3 + $0x28] sm:$0xff]  ;;  %v697_v8 = vld [vmem:[%s1047_s1 + $0x10] sm:$0xff]  ;;  %vm290_vm1 = vcmask 572416   ;;  %vm399_vm2 = vcmask 39936  }
  0x12   : > { %v703_v9 = vld [vmem:[%s1049_s3 + $0x20] sm:$0xff]  ;;  %s628_s20 = sshll.u32 %s233_s13, 3  ;;  %v696_v10 = vld [vmem:[%s1047_s1 + $0x8] sm:$0xff]  ;;  %v702_v15 = vld [vmem:[%s1049_s3 + $0x18] sm:$0xff] }
  0x13   : > { %v285_v3 = vpack.c.b16 %v280_v1, %v280_v1  ;;  %s235_s30 = scalar_lea.vmem %s1046_s0, %s628_s20  ;;  %v695_v11 = vld [vmem:[%s1047_s1] sm:$0xff]  ;;  %v701_v16 = vld [vmem:[%s1049_s3 + $0x10] sm:$0xff]  ;;  %v700_v17 = vld [vmem:[%s1049_s3 + $0x8] sm:$0xff]  ;;  %s224_s20 = sand.u32 1, %s846_s18  }
  0x14   : > { %v247_v12 = vld [vmem:[%s235_s30] sm:$0xff]  ;;  %v248_v13 = vld [vmem:[%s235_s30 + $0x8] sm:$0xff]  ;;  %s626_s23 = sshll.u32 %s224_s20, 4  ;;  %s410_s18 = ssub.s32 (%p943_p4), 5, %s951_s29 }
  0x15   : > { %v296_v5 = vsel %vm294_vm0, %v285_v3, 0  ;;  %380 = vmatpush.bf16.msra.mxu1 %v705_v4  ;;  %v249_v14 = vpack.c.bf16 %v248_v13, %v247_v12  ;;  %v699_v18 = vld [vmem:[%s1049_s3] sm:$0xff]  ;;  %s1001_s28 = scalar_lea.vmem [#allocation2], %s626_s23   ;;  %s707_s30 = sshll.u32 (%p943_p4), %s931_s21, 4 }
  0x16   : > { %301 = vmatpush.bf16.msra.mxu0 %v296_v5  ;;  %v798_v20 = vld [vmem:[%s1048_s2] ss:$0 sm:$0xff]  ;;  %p411_p8 = scmp.lt.s32.totalorder (%p943_p4), %s410_s18, 2  ;;  %s1012_s8 = scalar_lea.vmem (%p943_p4), %s1051_s5, %s707_s30  }
  0x17   : > { %v799_v27 = vld [vmem:[%s1050_s4] ss:$0 sm:$0xff] }
  0x19   : > { %381 = vmatpush.bf16.msra.mxu1 %v704_v7 }
  0x1a   : > { %302 = vmatpush.bf16.msra.mxu0 %v698_v6 }
  0x1d   : > { %382 = vmatpush.bf16.msra.mxu1 %v703_v9 }
  0x1e   : > { %303 = vmatpush.bf16.msra.mxu0 %v697_v8 }
  0x21   : > { %383 = vmatpush.bf16.msra.mxu1 %v702_v15 }
  0x22   : > { %304 = vmatpush.bf16.msra.mxu0 %v696_v10 }
  0x25   : > { %384 = vmatpush.bf16.msra.mxu1 %v701_v16 }
  0x26   : > { %305 = vmatpush.bf16.msra.mxu0 %v695_v11 }
  0x29   : > { %645 = vmatmul.msk.bf16.vlgmr.msra.gmra.mxu0 %vm290_vm1, %v249_v14  ;;  %385 = vmatpush.bf16.msra.mxu1 %v700_v17 }
  0x2d   : > { %386 = vmatpush.bf16.msra.mxu1 %v699_v18 }
  0xa6   : > { %v307_v19 = vpop.f32.mrf.mxu0 }
  0xa7   : > { %v308_v21 = vadd.f32 %v798_v20, %v307_v19 }
  0xa9   : > { %v312_v24 = vmax.f32 %v308_v21, 0.0 }
  0xae   : > { %v309_v22 = vpop.f32.mrf.mxu0 }
  0xaf   : > { %v310_v23 = vadd.f32 %v798_v20, %v309_v22 }
  0xb1   : > { %v313_v25 = vmax.f32 %v310_v23, 0.0 }
  0xb3   : > { %v314_v26 = vpack.c.bf16 %v313_v25, %v312_v24 }
  0xb5   : > { %387 = vmatmul.bf16.vlgmr.msra.gmra.mxu1 %v314_v26 }
 0x132   : > { %v388_v28 = vpop.f32.mrf.mxu1 }
 0x133   : > { %v397_v29 = vadd.f32 %v799_v27, %v388_v28 }
 0x135   : > { %400 = vst.msk [vmem:[%s1001_s28] sm:$0xff] %vm399_vm2, %v397_v29 }
 0x139   : > { %408 = sbr.rel (!%p943_p4) target bundleno = 357 (0x165), region = 44 }
 0x13a   : > { %v390_v30 = vpop.f32.mrf.mxu1 }
 0x13b   : > { %v398_v31 = vadd.f32 %v799_v27, %v390_v30 }
 0x13d   : > { %401 = vst.msk [vmem:[%s1001_s28 + $0x8] sm:$0xff] %vm399_vm2, %v398_v31 }
 0x13e   : > { %s1057_s18 = smov (!%p411_p8, %s410_s18), 2 }
 0x13f   : > { %s680_s9 = sshll.u32 %s1057_s18, 3 }
 0x140   : > { %p683_p9 = scmp.eq.s32.totalorder %s680_s9, 0 }
 0x141   : > { %s1018_s10 = sshrl.u32 (!%p683_p9), %s1057_s18, 1 }
 0x142   : > { %419 = sbr.rel (%p683_p9) target bundleno = 357 (0x165), region = 48  ;;  %p684_p10 = scmp.le.s32.totalorder (!%p683_p9), %s1018_s10, 0 }
 0x147   : > { %578 = sbr.rel (%p684_p10) target bundleno = 340 (0x154), region = 124  ;;  %s856_s21 = smov (!%p684_p10), %s1012_s8  }
 0x148   : > { %s860_s26 = smov (!%p684_p10), %s1001_s28   ;;  %s864_s29 = smov (!%p684_p10), 0  }
 0x149   : > { %s868_s11 = smov (!%p684_p10), 0  }
 0x14c LB: >> { %v484_v32 = vld [vmem:[%s862_s26] sm:$0xff]  ;;  %v486_v33 = vld [vmem:[%s862_s26 + $0x8] sm:$0xff]  ;;  %s488_s12 = sadd.s32 1, %s866_s29  ;;  %s478_s11 = sadd.s32 1, %s870_s11   ;;  %s870_s11 = sphi %s868_s11, %s478_s11   ;;  %s866_s29 = sphi %s864_s29, %s865_s29   ;;  %s862_s26 = sphi %s860_s26, %s493_s26   ;;  %s858_s21 = sphi %s856_s21, %s494_s21  }
 0x14d   : >> { %485 = vst [vmem:[%s858_s21] sm:$0xff] %v484_v32  ;;  %p489_p11 = scmp.ge.s32.totalorder %s488_s12, %s1018_s10  ;;  %p477_p12 = scmp.ge.s32.totalorder %s478_s11, %s1018_s10 }
 0x14e   : >> { %487 = vst [vmem:[%s858_s21 + $0x8] sm:$0xff] %v486_v33 }
 0x14f   : >> { %s1059_s12 = smov (%p489_p11, %s488_s12), 0  ;;  %480 = sbr.rel (!%p477_p12) target bundleno = 332 (0x14c), region = 130 }
 0x150   : >> { %s685_s13 = sshll.u32 %s1059_s12, 4  ;;  %s865_s29 = smov %s1059_s12  }
 0x151   : >> { %s493_s26 = scalar_lea.vmem %s1001_s28, %s685_s13 [#allocation2]   ;;  %s494_s21 = scalar_lea.vmem %s1012_s8, %s685_s13  }
 0x154 PF: > { %s1028_s14 = sand.u32 1, %s1057_s18   ;;  %s708_s15 = sshll.u32 %s1018_s10, 4 }
 0x155   : > { %s499_s16 = scalar_lea.vmem %s1001_s28, %s708_s15 [#allocation2]   ;;  %s501_s17 = scalar_lea.vmem %s1012_s8, %s708_s15  }
 0x156   : > { %p690_p13 = scmp.le.s32.totalorder %s1028_s14, 0 }
 0x157   : > { %s872_s20 = smov (!%p690_p13), %s501_s17   ;;  %s876_s23 = smov (!%p690_p13), %s499_s16  }
 0x158   : > { %592 = sbr.rel (%p690_p13) target bundleno = 357 (0x165), region = 135  ;;  %s880_s24 = smov (!%p690_p13), 0  }
 0x159   : > { %s884_s27 = smov (!%p690_p13), 0  }
 0x15d LB: >> { %v511_v34 = vld [vmem:[%s878_s23] sm:$0xff]  ;;  %s513_s18 = sadd.s32 1, %s882_s24  ;;  %s505_s27 = sadd.s32 1, %s886_s27   ;;  %s886_s27 = sphi %s884_s27, %s505_s27   ;;  %s882_s24 = sphi %s880_s24, %s881_s24   ;;  %s878_s23 = sphi %s876_s23, %s518_s23   ;;  %s874_s20 = sphi %s872_s20, %s519_s20  }
 0x15e   : >> { %512 = vst [vmem:[%s874_s20] sm:$0xff] %v511_v34  ;;  %p514_p0 = scmp.ge.s32.totalorder %s513_s18, %s1028_s14  ;;  %p504_p1 = scmp.ge.s32.totalorder %s505_s27, %s1028_s14 }
 0x160   : >> { %s1061_s18 = smov (%p514_p0, %s513_s18), 0  ;;  %507 = sbr.rel (!%p504_p1) target bundleno = 349 (0x15d), region = 141 }
 0x161   : >> { %s691_s28 = sshll.u32 %s1061_s18, 3  ;;  %s881_s24 = smov %s1061_s18  }
 0x162   : >> { %s518_s23 = scalar_lea.vmem %s499_s16, %s691_s28 [#allocation2]   ;;  %s519_s20 = scalar_lea.vmem %s501_s17, %s691_s28  }
 0x165 PF: > { %p12_p2 = scmp.ge.s32.totalorder %s933_s22, 5   ;;  %s1053_s18 = smov %s850_s19 }
 0x166   : > { %s1054_s19 = smov %s941_s25  ;;  %s1055_s20 = smov %s933_s22 }
 0x167   :  { %14 = sbr.rel (!%p12_p2) target bundleno = 2 (0x2), region = 152 }

</bundles_post_ra>
